<compile_context>
chip_gen: v6e
topology: v6e:2x2x1
jax: 0.10.0
libtpu: 0.0.40
codegen_flags: <defaults>
</compile_context>

<pallas_src>
import functools

import jax
import jax.numpy as jnp
from jax import lax
from jax.experimental import pallas as pl
from jax.experimental.pallas import tpu as pltpu


def _round_up(x, m):
    return ((x + m - 1) // m) * m


def _cdiv(a, b):
    return -(-a // b)


def _vmem_budget_bytes():
    """Usable VMEM budget per generation, with headroom (v7x: ~56 MiB, v5e/v6e: ~112 MiB)."""
    try:
        cap = int(pltpu.get_tpu_info().vmem_capacity_bytes)
    except Exception:
        cap = 64 << 20  # conservative fallback (v7x-sized)
    return cap - max(8 << 20, cap // 8)


def _const_block_spec(block_shape, index_map):
    """Single-buffer a block whose index_map never changes (reclaims the dead copy)."""
    try:
        return pl.BlockSpec(block_shape, index_map, pipeline_mode=pl.Buffered(1))
    except Exception:  # older jax without pipeline_mode / Buffered
        return pl.BlockSpec(block_shape, index_map)


# ---------------------------------------------------------------------------
# Kernels
# ---------------------------------------------------------------------------

def _ebv_fused_kernel(x_ref, et_ref, o_ref, *, num_cls):
    # x_ref : (tile_n, D)        row tile of Xfeat (native dtype)
    # et_ref: (D, C_pad)         pre-transposed basis, classes zero-padded to 128
    # o_ref : (tile_n, num_cls)  probabilities (unpadded class columns)
    x = x_ref[...]

    # Row L2 norm with an f32 accumulator (no explicit full-tile f32 copy of x).
    norm_sq = jnp.sum(x * x, axis=1, keepdims=True, dtype=jnp.float32)
    # 1/max(||x||, 1e-12) == rsqrt(max(||x||^2, 1e-24))  -> EUP rsqrt
    inv_norm = lax.rsqrt(jnp.maximum(norm_sq, 1e-24))

    # logits = normalize(x) @ ebvecs.T ; normalization folded into a row scale.
    logits = jnp.dot(x, et_ref[...], preferred_element_type=jnp.float32)
    logits = logits * inv_norm

    c_pad = logits.shape[1]
    if num_cls < c_pad:
        col = lax.broadcasted_iota(jnp.int32, logits.shape, 1)
        logits = jnp.where(col < num_cls, logits, -jnp.inf)

    # Numerically stable softmax over classes.
    m = jnp.max(logits, axis=1, keepdims=True)
    ex = jnp.exp(logits - m)
    denom = jnp.sum(ex, axis=1, keepdims=True)
    probs = ex * pl.reciprocal(denom, approx=False)

    if num_cls < c_pad:
        probs = probs[:, :num_cls]       # store only the valid class columns
    o_ref[...] = probs.astype(o_ref.dtype)


def _ebv_stats_kernel(x_ref, et_ref, m_out, l_out, m_sc, l_sc, *, num_cls, tile_c):
    # Online softmax statistics (running max / running sum) over class tiles.
    j = pl.program_id(1)

    @pl.when(j == 0)
    def _():
        m_sc[...] = jnp.full(m_sc.shape, -jnp.inf, m_sc.dtype)
        l_sc[...] = jnp.zeros(l_sc.shape, l_sc.dtype)

    x = x_ref[...]
    norm_sq = jnp.sum(x * x, axis=1, keepdims=True, dtype=jnp.float32)
    inv_norm = lax.rsqrt(jnp.maximum(norm_sq, 1e-24))
    logits = jnp.dot(x, et_ref[...], preferred_element_type=jnp.float32) * inv_norm

    # Mask padded / out-of-range class columns so they take no softmax mass.
    col = j * tile_c + lax.broadcasted_iota(jnp.int32, logits.shape, 1)
    logits = jnp.where(col < num_cls, logits, -jnp.inf)

    m_prev = m_sc[...]
    m_new = jnp.maximum(m_prev, jnp.max(logits, axis=1, keepdims=True))
    l_sc[...] = l_sc[...] * jnp.exp(m_prev - m_new) + jnp.sum(
        jnp.exp(logits - m_new), axis=1, keepdims=True)
    m_sc[...] = m_new

    @pl.when(j == pl.num_programs(1) - 1)
    def _():
        m_out[...] = m_sc[...]
        l_out[...] = l_sc[...]


def _ebv_probs_kernel(x_ref, et_ref, m_ref, l_ref, o_ref):
    # Second pass: recompute the class-tile logits and normalize with global (m, l).
    x = x_ref[...]
    norm_sq = jnp.sum(x * x, axis=1, keepdims=True, dtype=jnp.float32)
    inv_norm = lax.rsqrt(jnp.maximum(norm_sq, 1e-24))
    logits = jnp.dot(x, et_ref[...], preferred_element_type=jnp.float32) * inv_norm
    # Columns >= num_cls fall outside the (n, num_cls) output array and are never
    # stored (partial out block), so no masking is needed here.
    probs = jnp.exp(logits - m_ref[...]) * pl.reciprocal(l_ref[...], approx=False)
    o_ref[...] = probs.astype(o_ref.dtype)


# ---------------------------------------------------------------------------
# Wrappers
# ---------------------------------------------------------------------------

def prepare_ebvecs(ebvecs, dtype=None):
    """One-time precompute (EBVs are fixed): transpose to (D, C_pad), classes padded to 128."""
    c, d = ebvecs.shape
    if dtype is None:
        dtype = ebvecs.dtype
    et = ebvecs.T.astype(dtype)                      # (D, C)
    c_pad = _round_up(c, 128)
    if c_pad != c:
        et = jnp.pad(et, ((0, 0), (0, c_pad - c)))   # (D, C_pad)
    return et


def _even_steps_tile(n, tile, row_align):
    """Keep the row-tile count even (>= 2 steps) so v7x's two TensorCores split evenly."""
    steps = _cdiv(n, tile)
    if steps > 1 and steps % 2 == 1:
        tile = _round_up(_cdiv(n, steps + 1), row_align)
    return tile


def _pick_fused_tile(n, d, num_cls, c_pad, isz, budget, tile_n_max, row_align):
    """Largest row tile fitting the VMEM budget for the fused path, or None if infeasible."""
    # Single-buffered resident basis + slack.
    fixed = d * c_pad * isz + (2 << 20)
    # Double-buffered x/out tiles + f32 intermediates (squared-x, logits/exp/probs).
    per_row = 2 * d * isz + 2 * num_cls * isz + 4 * d + 3 * 4 * c_pad
    avail = budget - fixed
    if avail <= per_row * row_align:
        return None
    tile = (avail // per_row) // row_align * row_align
    tile = min(tile, tile_n_max, _round_up(n, row_align))
    if tile < row_align or tile < min(64, _round_up(n, row_align)):
        return None                                   # degenerate -> class-tiled path
    return _even_steps_tile(n, tile, row_align)


def _ebv_fused(xfeat, et, num_cls, tile, budget):
    n, d = xfeat.shape
    c_pad = et.shape[1]
    dtype = xfeat.dtype
    isz = jnp.dtype(dtype).itemsize

    cost = pl.CostEstimate(
        flops=2 * n * d * c_pad,
        transcendentals=n * c_pad,
        bytes_accessed=isz * (n * d + d * c_pad + n * num_cls),
    )

    return pl.pallas_call(
        functools.partial(_ebv_fused_kernel, num_cls=num_cls),
        out_shape=jax.ShapeDtypeStruct((n, num_cls), dtype),
        grid_spec=pltpu.PrefetchScalarGridSpec(
            num_scalar_prefetch=0,
            grid=(_cdiv(n, tile),),
            in_specs=[
                pl.BlockSpec((tile, d), lambda i: (i, 0)),        # row tile of Xfeat
                _const_block_spec((d, c_pad), lambda i: (0, 0)),  # resident basis, 1 buffer
            ],
            # Last dim == full array dim -> no padded columns ever written to HBM.
            out_specs=pl.BlockSpec((tile, num_cls), lambda i: (i, 0)),
        ),
        compiler_params=pltpu.CompilerParams(
            dimension_semantics=("parallel",),
            vmem_limit_bytes=int(budget),
        ),
        cost_estimate=cost,
    )(xfeat, et)


def _ebv_class_tiled(xfeat, et, num_cls, tile_n_max, tile_c, budget, row_align):
    """Streaming-softmax path for class counts whose basis/logits do not fit VMEM."""
    n, d = xfeat.shape
    c_pad = et.shape[1]
    dtype = xfeat.dtype
    isz = jnp.dtype(dtype).itemsize

    tile_c = max(128, min(_round_up(tile_c, 128), c_pad))

    def fixed(tc):       # double-buffered streaming basis block + slack
        return 2 * d * tc * isz + (2 << 20)

    def per_row(tc):     # x/out/m/l buffers + f32 intermediates
        return 2 * d * isz + 2 * tc * isz + 16 + 4 * d + 3 * 4 * tc

    while tile_c > 128 and budget - fixed(tile_c) < per_row(tile_c) * row_align:
        tile_c = _round_up(tile_c // 2, 128)

    avail = budget - fixed(tile_c)
    if avail > per_row(tile_c) * row_align:
        tile = (avail // per_row(tile_c)) // row_align * row_align
    else:
        tile = row_align
    tile = max(row_align, min(tile, tile_n_max, _round_up(n, row_align)))
    tile = _even_steps_tile(n, tile, row_align)

    row_grid = _cdiv(n, tile)
    cls_grid = _cdiv(c_pad, tile_c)

    stats_cost = pl.CostEstimate(
        flops=2 * n * d * c_pad,
        transcendentals=n * c_pad,
        bytes_accessed=isz * (n * d + d * c_pad * row_grid) + 8 * n,
    )
    m, l = pl.pallas_call(
        functools.partial(_ebv_stats_kernel, num_cls=num_cls, tile_c=tile_c),
        out_shape=(jax.ShapeDtypeStruct((n, 1), jnp.float32),
                   jax.ShapeDtypeStruct((n, 1), jnp.float32)),
        grid_spec=pltpu.PrefetchScalarGridSpec(
            num_scalar_prefetch=0,
            grid=(row_grid, cls_grid),
            in_specs=[
                pl.BlockSpec((tile, d), lambda i, j: (i, 0)),
                pl.BlockSpec((d, tile_c), lambda i, j: (0, j)),
            ],
            out_specs=(pl.BlockSpec((tile, 1), lambda i, j: (i, 0)),
                       pl.BlockSpec((tile, 1), lambda i, j: (i, 0))),
            scratch_shapes=[pltpu.VMEM((tile, 1), jnp.float32),
                            pltpu.VMEM((tile, 1), jnp.float32)],
        ),
        compiler_params=pltpu.CompilerParams(
            dimension_semantics=("parallel", "arbitrary"),
            vmem_limit_bytes=int(budget),
        ),
        cost_estimate=stats_cost,
    )(xfeat, et)

    probs_cost = pl.CostEstimate(
        flops=2 * n * d * c_pad,
        transcendentals=n * c_pad,
        bytes_accessed=isz * (n * d + d * c_pad * row_grid + n * num_cls) + 8 * n,
    )
    out = pl.pallas_call(
        _ebv_probs_kernel,
        out_shape=jax.ShapeDtypeStruct((n, num_cls), dtype),
        grid_spec=pltpu.PrefetchScalarGridSpec(
            num_scalar_prefetch=0,
            grid=(row_grid, cls_grid),
            in_specs=[
                pl.BlockSpec((tile, d), lambda i, j: (i, 0)),
                pl.BlockSpec((d, tile_c), lambda i, j: (0, j)),
                pl.BlockSpec((tile, 1), lambda i, j: (i, 0)),
                pl.BlockSpec((tile, 1), lambda i, j: (i, 0)),
            ],
            out_specs=pl.BlockSpec((tile, tile_c), lambda i, j: (i, j)),
        ),
        compiler_params=pltpu.CompilerParams(
            dimension_semantics=("parallel", "parallel"),
            vmem_limit_bytes=int(budget),
        ),
        cost_estimate=probs_cost,
    )(xfeat, et, m, l)
    return out


def ebv_layer_apply(xfeat, et, num_cls, *, tile_n=512, tile_c=1024,
                    force_class_tiled=False):
    """xfeat: (num_samp, basis_dim), et: prepared (basis_dim, C_pad) -> (num_samp, num_cls)."""
    n, d = xfeat.shape
    d2, c_pad = et.shape
    assert d == d2, "basis_dim mismatch between Xfeat and prepared basis"
    assert c_pad >= num_cls and c_pad % 128 == 0, "use prepare_ebvecs() for the basis"

    dtype = xfeat.dtype
    isz = jnp.dtype(dtype).itemsize
    row_align = 16 if dtype == jnp.bfloat16 else 8
    budget = _vmem_budget_bytes()

    tile = None
    if not force_class_tiled:
        tile = _pick_fused_tile(n, d, num_cls, c_pad, isz, budget, tile_n, row_align)
    if tile is not None:
        return _ebv_fused(xfeat, et, num_cls, tile, budget)
    return _ebv_class_tiled(xfeat, et, num_cls, tile_n, tile_c, budget, row_align)


def ebv_layer(xfeat, ebvecs, **kwargs):
    """Convenience wrapper mirroring EBV_Layer.forward (prepares the basis per call)."""
    et = prepare_ebvecs(ebvecs, dtype=xfeat.dtype)
    return ebv_layer_apply(xfeat, et, ebvecs.shape[0], **kwargs)


def ebv_layer_ref(xfeat, ebvecs):
    """Pure-JAX reference mirroring the PyTorch forward."""
    norm = jnp.sqrt(jnp.sum(xfeat * xfeat, axis=1, keepdims=True))
    xn = xfeat / jnp.maximum(norm, 1e-12)
    return jax.nn.softmax(xn @ ebvecs.T, axis=1)


if __name__ == "__main__":
    key = jax.random.PRNGKey(0)
    kx1, ke1, kx2, ke2 = jax.random.split(key, 4)

    # --- Test 1: small shapes through the fused single-pass path ---
    num_samp, basis_dim, num_cls = 16, 128, 8
    xfeat = jax.random.normal(kx1, (num_samp, basis_dim), dtype=jnp.float32)
    ebvecs = jax.random.normal(ke1, (num_cls, basis_dim), dtype=jnp.float32)
    ebvecs = ebvecs / jnp.linalg.norm(ebvecs, axis=1, keepdims=True)

    et = prepare_ebvecs(ebvecs)                 # one-time basis precompute (hoisted)
    out = jax.block_until_ready(ebv_layer_apply(xfeat, et, num_cls))
    ref = ebv_layer_ref(xfeat, ebvecs)
    assert out.shape == (num_samp, num_cls)
    assert jnp.allclose(out, ref, atol=1e-5, rtol=1e-5), "fused path mismatch vs reference"
    assert jnp.allclose(jnp.sum(out, axis=1), 1.0, atol=1e-5), "rows must sum to 1"

    # --- Test 2: force the class-tiled streaming-softmax path (large-num_cls fallback) ---
    num_cls2 = 300
    xfeat2 = jax.random.normal(kx2, (num_samp, basis_dim), dtype=jnp.float32)
    ebvecs2 = jax.random.normal(ke2, (num_cls2, basis_dim), dtype=jnp.float32)
    ebvecs2 = ebvecs2 / jnp.linalg.norm(ebvecs2, axis=1, keepdims=True)
    et2 = prepare_ebvecs(ebvecs2)
    out2 = jax.block_until_ready(
        ebv_layer_apply(xfeat2, et2, num_cls2, tile_c=128, force_class_tiled=True))
    ref2 = ebv_layer_ref(xfeat2, ebvecs2)
    assert out2.shape == (num_samp, num_cls2)
    assert jnp.allclose(out2, ref2, atol=1e-5, rtol=1e-5), "class-tiled path mismatch"
    assert jnp.allclose(jnp.sum(out2, axis=1), 1.0, atol=1e-5), "rows must sum to 1"

    print("KERNEL_OK")
</pallas_src>

<mosaic_0001>
module attributes {stable_mosaic.version = 11 : i64} {
  func.func @_ebv_fused_kernel(%arg0: i32, %arg1: memref<16x128xf32, #tpu.memory_space<vmem>>, %arg2: memref<128x128xf32, #tpu.memory_space<vmem>>, %arg3: memref<16x8xf32, #tpu.memory_space<vmem>>) attributes {dimension_semantics = [#tpu.dimension_semantics<parallel>], iteration_bounds = array<i64: 1>, scalar_prefetch = 0 : i64, scratch_operands = 0 : i64, tpu.core_type = #tpu.core_type<tc>, window_params = [{transform_indices = @transform_0, window_bounds = array<i64: 16, 128>}, {pipeline_mode = #tpu.pipeline_mode<synchronous>, transform_indices = @transform_1, window_bounds = array<i64: 128, 128>}, {transform_indices = @transform_2, window_bounds = array<i64: 16, 8>}]} {
    %c0 = arith.constant 0 : index
    %c0_0 = arith.constant 0 : index
    %0 = vector.load %arg1[%c0, %c0_0] : memref<16x128xf32, #tpu.memory_space<vmem>>, vector<16x128xf32>
    %1 = arith.mulf %0, %0 : vector<16x128xf32>
    %cst = arith.constant dense<0.000000e+00> : vector<16xf32>
    %2 = vector.multi_reduction <add>, %1, %cst [1] : vector<16x128xf32> to vector<16xf32>
    %3 = vector.shape_cast %2 : vector<16xf32> to vector<16x1xf32>
    %cst_1 = arith.constant 1.000000e-24 : f32
    %4 = vector.broadcast %cst_1 : f32 to vector<16x1xf32>
    %5 = arith.maximumf %3, %4 : vector<16x1xf32>
    %6 = math.rsqrt %5 : vector<16x1xf32>
    %c0_2 = arith.constant 0 : index
    %c0_3 = arith.constant 0 : index
    %7 = vector.load %arg2[%c0_2, %c0_3] : memref<128x128xf32, #tpu.memory_space<vmem>>, vector<128x128xf32>
    %cst_4 = arith.constant dense<0.000000e+00> : vector<16x128xf32>
    %8 = tpu.matmul %0, %7, %cst_4 {dimension_numbers = #tpu.dot_dimension_numbers<[1], [0], [0], [1], [0, 0, 1, 1], [], []>} : vector<16x128xf32>, vector<128x128xf32>, vector<16x128xf32> -> vector<16x128xf32>
    %9 = vector.broadcast %6 : vector<16x1xf32> to vector<16x128xf32>
    %10 = arith.mulf %8, %9 : vector<16x128xf32>
    %11 = tpu.iota {dimensions = array<i32: 1>} : vector<16x128xi32>
    %c8_i32 = arith.constant 8 : i32
    %12 = vector.broadcast %c8_i32 : i32 to vector<16x128xi32>
    %13 = arith.cmpi slt, %11, %12 : vector<16x128xi32>
    %cst_5 = arith.constant 0xFF800000 : f32
    %14 = vector.broadcast %cst_5 : f32 to vector<16x128xf32>
    %15 = arith.select %13, %10, %14 : vector<16x128xi1>, vector<16x128xf32>
    %cst_6 = arith.constant dense<0xFF800000> : vector<16xf32>
    %16 = vector.multi_reduction <maximumf>, %15, %cst_6 [1] : vector<16x128xf32> to vector<16xf32>
    %17 = vector.shape_cast %16 : vector<16xf32> to vector<16x1xf32>
    %18 = vector.broadcast %17 : vector<16x1xf32> to vector<16x128xf32>
    %19 = arith.subf %15, %18 : vector<16x128xf32>
    %20 = math.exp %19 : vector<16x128xf32>
    %cst_7 = arith.constant dense<0.000000e+00> : vector<16xf32>
    %21 = vector.multi_reduction <add>, %20, %cst_7 [1] : vector<16x128xf32> to vector<16xf32>
    %22 = vector.shape_cast %21 : vector<16xf32> to vector<16x1xf32>
    %23 = tpu.reciprocal %22 : vector<16x1xf32> -> vector<16x1xf32>
    %24 = vector.broadcast %23 : vector<16x1xf32> to vector<16x128xf32>
    %25 = arith.mulf %20, %24 : vector<16x128xf32>
    %26 = vector.extract_strided_slice %25 {offsets = [0, 0], sizes = [16, 8], strides = [1, 1]} : vector<16x128xf32> to vector<16x8xf32>
    %c0_8 = arith.constant 0 : index
    %c0_9 = arith.constant 0 : index
    %27 = vector.load %arg3[%c0_8, %c0_9] : memref<16x8xf32, #tpu.memory_space<vmem>>, vector<16x8xf32>
    tpu.vector_store %arg3[%c0_8, %c0_9], %26 {strides = array<i32>} : memref<16x8xf32, #tpu.memory_space<vmem>>, vector<16x8xf32>,
    return
  }
  func.func @transform_0(%arg0: i32) -> (i32, i32) {
    %c0_i32 = arith.constant 0 : i32
    %c0_i32_0 = arith.constant 0 : i32
    return %arg0, %c0_i32 : i32, i32
  }
  func.func @transform_1(%arg0: i32) -> (i32, i32) {
    %c0_i32 = arith.constant 0 : i32
    %c0_i32_0 = arith.constant 0 : i32
    %c0_i32_1 = arith.constant 0 : i32
    return %c0_i32, %c0_i32_0 : i32, i32
  }
  func.func @transform_2(%arg0: i32) -> (i32, i32) {
    %c0_i32 = arith.constant 0 : i32
    %c0_i32_0 = arith.constant 0 : i32
    return %arg0, %c0_i32 : i32, i32
  }
}

</mosaic_0001>

<bundles_post_ra>
// kernel: tpu_custom_call.1
= control target key start
LH: loop header
LB: loop body
LE: loop exit
PB: predicated region body
PF: predicated region fallthrough
CT: control target
= control target key end

     0   :  { %7 = vsyncpa [#allocation3], 0  ;;  %s320_s0 = inlined_call_operand.hbm [shape: f32[16,128], index: 0, kind: input, shape index: {}]   ;;  %s321_s1 = inlined_call_operand.hbm [shape: f32[128,128], index: 1, kind: input, shape index: {}]   ;;  %s322_s2 = inlined_call_operand.vmem [shape: f32[16,8], index: 2, kind: output, shape index: {}]  }
   0x1   :  { %8 = vsyncpa [#allocation5], 0  ;;  %s289_s9 = smov [#allocation2]  }
   0x2   :  { %s14_s10 = sshll.u32 %s289_s9, 4  ;;  %s15_s10 = int_to_ptr.vmem [resolvable:$true] %s14_s10 }
   0x3   :  { %s253_s11 = scalar_lea.vmem %s15_s10, 256  ;;  %p258_p1 = scmp.lt.s32.totalorder %s15_s10, %s15_s10 }
   0x4   :  { %p254_p0 = scmp.ne.s32.totalorder %s15_s10, %s253_s11  ;;  %p259_p2 = scmp.lt.s32.totalorder %s253_s11, %s253_s11 }
   0x6   :  { %p260_p3 = por %p259_p2, %p258_p1 }
   0x8   :  { %p261_p4 = pnand %p260_p3, %p254_p0 }
   0xa   :  { %264 = shalt.err (!%p261_p4)
}
   0xb   :  { %s290_s12 = smov 128   ;;  %s291_s13 = smov 8  }
   0xc   :  { %20 = dma.hbm_to_vmem [thread:$0]  %s320_s0, 256, %s15_s10, [#allocation3], %s290_s12, %s290_s12, %s291_s13  }
   0xd   :  { %s292_s16 = smov [#allocation4]  }
   0xe   :  { %s26_s17 = sshll.u32 %s292_s16, 4  ;;  %s27_s17 = int_to_ptr.vmem [resolvable:$true] %s26_s17 }
   0xf   :  { %s273_s18 = scalar_lea.vmem %s27_s17, 2048  ;;  %p278_p6 = scmp.lt.s32.totalorder %s27_s17, %s27_s17 }
  0x10   :  { %p274_p5 = scmp.ne.s32.totalorder %s27_s17, %s273_s18  ;;  %p279_p7 = scmp.lt.s32.totalorder %s273_s18, %s273_s18 }
  0x12   :  { %p280_p8 = por %p279_p7, %p278_p6 }
  0x14   :  { %p281_p9 = pnand %p280_p8, %p274_p5 }
  0x16   :  { %284 = shalt.err (!%p281_p9)
}
  0x17   :  { %32 = dma.hbm_to_vmem [thread:$0]  %s321_s1, 2048, %s27_s17, [#allocation5], %s290_s12, %s290_s12, %s291_s13  }
  0x18   :  { %285 = dma.done.wait [#allocation3], 256  }
  0x19   :  { %286 = vsyncadd [#allocation3], 4294967040 }
  0x1a   :  { %287 = dma.done.wait [#allocation5], 2048  }
  0x1b   :  { %288 = vsyncadd [#allocation5], 4294965248  ;;  %v66_v0 = vld [vmem:[#allocation4 + $0x78] sm:$0xff]  ;;  %v65_v1 = vld [vmem:[#allocation4 + $0x70] sm:$0xff]  ;;  %v144_v24 = vlaneseq  ;;  %vm167_vm1 = vcmask 64512  }
  0x1c   :  { %194 = vmatprep.subr.mxu0 %v66_v0  ;;  %v64_v2 = vld [vmem:[#allocation4 + $0x68] sm:$0xff]  ;;  %v63_v3 = vld [vmem:[#allocation4 + $0x60] sm:$0xff]  ;;  %v39_v4 = vld [vmem:[#allocation2] sm:$0xff] }
  0x1d   :  { %195 = vmatpush3.msra.mxu0 %v66_v0  ;;  %v62_v5 = vld [vmem:[#allocation4 + $0x58] sm:$0xff]  ;;  %226 = vmatprep.mubr.f32.mxu0 %v39_v4  ;;  %v41_v6 = vmul.f32 %v39_v4, %v39_v4  ;;  %v61_v8 = vld [vmem:[#allocation4 + $0x50] sm:$0xff]  ;;  %v60_v10 = vld [vmem:[#allocation4 + $0x48] sm:$0xff]  ;;  %v145_v27 = vand.u32 127, %v144_v24 }
  0x1e   :  { %196 = vmatprep.subr.mxu0 %v65_v1  ;;  %v40_v7 = vld [vmem:[#allocation2 + $0x8] sm:$0xff]  ;;  %v59_v11 = vld [vmem:[#allocation4 + $0x40] sm:$0xff]  ;;  %v57_v13 = vld [vmem:[#allocation4 + $0x30] sm:$0xff] }
  0x1f   :  { %197 = vmatpush3.msra.mxu0 %v65_v1  ;;  %43 = vadd.xlane.f32.xlu0 %v41_v6  ;;  %v42_v9 = vmul.f32 %v40_v7, %v40_v7  ;;  %v58_v12 = vld [vmem:[#allocation4 + $0x38] sm:$0xff]  ;;  %v56_v14 = vld [vmem:[#allocation4 + $0x28] sm:$0xff]  ;;  %v55_v15 = vld [vmem:[#allocation4 + $0x20] sm:$0xff]  ;;  %vm146_vm0 = vcmp.lt.s32.totalorder %v145_v27, 8 }
  0x20   :  { %198 = vmatprep.subr.mxu0 %v64_v2  ;;  %v54_v16 = vld [vmem:[#allocation4 + $0x18] sm:$0xff]  ;;  %v53_v17 = vld [vmem:[#allocation4 + $0x10] sm:$0xff]  ;;  %v52_v18 = vld [vmem:[#allocation4 + $0x8] sm:$0xff] }
  0x21   :  { %199 = vmatpush3.msra.mxu0 %v64_v2  ;;  %v51_v19 = vld [vmem:[#allocation4] sm:$0xff] }
  0x22   :  { %200 = vmatprep.subr.mxu0 %v63_v3 }
  0x23   :  { %201 = vmatpush3.msra.mxu0 %v63_v3  ;;  %45 = vadd.xlane.f32.xlu0 %v42_v9 }
  0x24   :  { %202 = vmatprep.subr.mxu0 %v62_v5 }
  0x25   :  { %203 = vmatpush3.msra.mxu0 %v62_v5 }
  0x26   :  { %204 = vmatprep.subr.mxu0 %v61_v8 }
  0x27   :  { %205 = vmatpush3.msra.mxu0 %v61_v8 }
  0x28   :  { %206 = vmatprep.subr.mxu0 %v60_v10 }
  0x29   :  { %207 = vmatpush3.msra.mxu0 %v60_v10 }
  0x2a   :  { %208 = vmatprep.subr.mxu0 %v59_v11 }
  0x2b   :  { %209 = vmatpush3.msra.mxu0 %v59_v11 }
  0x2c   :  { %210 = vmatprep.subr.mxu0 %v58_v12 }
  0x2d   :  { %211 = vmatpush3.msra.mxu0 %v58_v12 }
  0x2e   :  { %212 = vmatprep.subr.mxu0 %v57_v13 }
  0x2f   :  { %213 = vmatpush3.msra.mxu0 %v57_v13 }
  0x30   :  { %214 = vmatprep.subr.mxu0 %v56_v14 }
  0x31   :  { %215 = vmatpush3.msra.mxu0 %v56_v14 }
  0x32   :  { %216 = vmatprep.subr.mxu0 %v55_v15 }
  0x33   :  { %217 = vmatpush3.msra.mxu0 %v55_v15 }
  0x34   :  { %218 = vmatprep.subr.mxu0 %v54_v16 }
  0x35   :  { %219 = vmatpush3.msra.mxu0 %v54_v16 }
  0x36   :  { %220 = vmatprep.subr.mxu0 %v53_v17 }
  0x37   :  { %221 = vmatpush3.msra.mxu0 %v53_v17 }
  0x38   :  { %222 = vmatprep.subr.mxu0 %v52_v18 }
  0x39   :  { %223 = vmatpush3.msra.mxu0 %v52_v18 }
  0x3a   :  { %224 = vmatprep.subr.mxu0 %v51_v19 }
  0x3b   :  { %225 = vmatpush3.msra.mxu0 %v51_v19 }
  0x3c   :  { %227 = vmatmul.mubr.f32.vlgmr.msra.gmra.mxu0 %v40_v7 }
  0xa8   :  { %v44_v20 = vpop.xlane.xlu0 %43 }
  0xa9   :  { %v47_v22 = vmax.f32 %v44_v20, 1e-24 }
  0xab   :  { %233 = vrsqrt.f32 %v47_v22 }
  0xac   :  { %v46_v21 = vpop.xlane.xlu0 %45 }
  0xad   :  { %v48_v23 = vmax.f32 %v46_v21, 1e-24 }
  0xaf   :  { %235 = vrsqrt.f32 %v48_v23 }
  0xb8   :  { %v234_v25 = vpop.eup %233 }
  0xbc   :  { %v236_v28 = vpop.eup %235 }
  0xfc   :  { %v228_v26 = vpop.f32.mrf.mxu0 }
  0xfd   :  { %v143_v31 = vmul.f32 %v236_v28, %v228_v26 }
  0xfe   :  { %v133_v29 = vpop.f32.mrf.mxu0 }
  0xff   :  { %v142_v30 = vmul.f32 %v234_v25, %v133_v29  ;;  %v148_v33 = vsel %vm146_vm0, %v143_v31, -inf }
 0x101   :  { %v147_v32 = vsel %vm146_vm0, %v142_v30, -inf }
 0x102   :  { %149 = vmax.xlane.f32.xlu1 %v147_v32 }
 0x106   :  { %151 = vmax.xlane.f32.xlu1 %v148_v33 }
 0x18b   :  { %v150_v34 = vpop.xlane.xlu1 %149 }
 0x18c   :  { %v153_v35 = vsub.f32 %v147_v32, %v150_v34 }
 0x18e   :  { %v155_v36 = vmul.f32 1.442695, %v153_v35 }
 0x18f   :  { %v152_v37 = vpop.xlane.xlu1 %151 }
 0x190   :  { %237 = vpow2.f32 %v155_v36  ;;  %v154_v38 = vsub.f32 %v148_v33, %v152_v37 }
 0x192   :  { %v157_v39 = vmul.f32 1.442695, %v154_v38 }
 0x194   :  { %239 = vpow2.f32 %v157_v39 }
 0x19d   :  { %v238_v40 = vpop.eup %237 }
 0x19e   :  { %159 = vadd.xlane.f32.xlu0 %v238_v40 }
 0x1a1   :  { %v240_v41 = vpop.eup %239 }
 0x1a2   :  { %161 = vadd.xlane.f32.xlu1 %v240_v41 }
 0x227   :  { %v160_v42 = vpop.xlane.xlu0 %159 }
 0x228   :  { %241 = vrcp.f32 %v160_v42 }
 0x22b   :  { %v162_v43 = vpop.xlane.xlu1 %161 }
 0x22c   :  { %243 = vrcp.f32 %v162_v43 }
 0x235   :  { %v242_v44 = vpop.eup %241 }
 0x236   :  { %v165_v45 = vmul.f32 %v242_v44, %v238_v40 }
 0x238   :  { %168 = vst.msk [vmem:[%s322_s2] sm:$0xff] %vm167_vm1, %v165_v45 }
 0x239   :  { %v244_v46 = vpop.eup %243 }
 0x23a   :  { %v166_v47 = vmul.f32 %v244_v46, %v240_v41 }
 0x23c   :  { %169 = vst.msk [vmem:[%s322_s2 + $0x8] sm:$0xff] %vm167_vm1, %v166_v47 }
 0x23d   :  { %174 = vsyncpa [#allocation3], 1 }
 0x23e   :  { %175 = vsyncpa [#allocation5], 1 }

</bundles_post_ra>
